<compile_context>
chip_gen: v5e
topology: v5e:2x2
jax: 0.10.0
libtpu: 0.0.40
codegen_flags: <defaults>
</compile_context>

<pallas_src>
import numpy as np
import jax
import jax.numpy as jnp
from jax import lax
from jax.experimental import pallas as pl
from jax.experimental.pallas import tpu as pltpu

_LANES = 128
_MAX_TILE_ROWS = 2048  # 2048 x 128 f32 = 1 MiB per buffer per tile


def _host_mix32(x: int) -> int:
    """lowbias32 hash, done once on the host (Python ints, 32-bit wrap)."""
    x &= 0xFFFFFFFF
    x ^= x >> 16
    x = (x * 0x7FEB352D) & 0xFFFFFFFF
    x ^= x >> 15
    x = (x * 0x846CA68B) & 0xFFFFFFFF
    x ^= x >> 16
    return x


def _kernel(seed_ref, lower_ref, upper_ref, out_ref):
    j = pl.program_id(0)               # row-tile index (outer)
    i = pl.program_id(1)               # sample index   (inner)
    n_samples = pl.num_programs(1)

    tile_rows = lower_ref.shape[0]     # static
    tile_elems = tile_rows * _LANES

    # Unique per-element counter across (tile, sample, row, lane).
    base = (j * n_samples + i) * tile_elems                      # int32 scalar
    row = lax.broadcasted_iota(jnp.int32, (tile_rows, _LANES), 0)
    lane = lax.broadcasted_iota(jnp.int32, (tile_rows, _LANES), 1)
    counter = (base + row * _LANES + lane).astype(jnp.uint32)

    # Single murmur3 fmix32 finalizer over (counter ^ host-mixed seed).
    s = seed_ref[0].astype(jnp.uint32)
    bits = counter ^ s
    bits = bits ^ (bits >> 16)
    bits = bits * jnp.uint32(0x85EBCA6B)
    bits = bits ^ (bits >> 13)
    bits = bits * jnp.uint32(0xC2B2AE35)
    bits = bits ^ (bits >> 16)

    # Uniform in [0, 1): top 24 bits are exactly representable in f32.
    u = (bits >> 8).astype(jnp.int32).astype(jnp.float32)
    u = u * jnp.float32(1.0 / (1 << 24))

    lo = lower_ref[...].astype(jnp.float32)
    up = upper_ref[...].astype(jnp.float32)
    out_ref[0] = (lo + u * (up - lo)).astype(out_ref.dtype)


def sample_uniform(x: jax.Array, dim: int, k: int, seed: int = 0) -> jax.Array:
    """Pallas equivalent of SampleUniform(dim).forward(x, k)."""
    assert x.shape[-1] == 2 * dim, "last dim of x must equal 2*dim"
    lower = x[..., :dim]
    upper = x[..., dim:]

    batch_shape = lower.shape[:-1]
    n = int(np.prod(batch_shape, dtype=np.int64)) * dim

    # Lane-dense layout: flatten to rows of 128 lanes.  Tight padding:
    # tile_rows = round_up_8(ceil(rows / n_tiles)), so pad < 8 rows per tile.
    rows_needed = max(1, -(-n // _LANES))
    n_tiles = -(-rows_needed // _MAX_TILE_ROWS)
    if n_tiles == 1 and k == 1 and rows_needed > 8:
        n_tiles = 2                    # keep both v7x TensorCores busy
    tile_rows = ((-(-rows_needed // n_tiles) + 7) // 8) * 8
    total_rows = n_tiles * tile_rows
    n_pad = total_rows * _LANES

    def _flat(a):
        a = a.reshape(-1)
        if n_pad != n:
            a = jnp.pad(a, (0, n_pad - n))
        return a.reshape(total_rows, _LANES)

    lower2 = _flat(lower)
    upper2 = _flat(upper)

    # Runtime seed scalar (no per-seed recompile); mixing done on host.
    mixed = _host_mix32(int(seed) ^ 0x9E3779B9)
    seed_arr = jnp.asarray(np.array([mixed], dtype=np.uint32).view(np.int32))

    out = pl.pallas_call(
        _kernel,
        out_shape=jax.ShapeDtypeStruct((k, total_rows, _LANES), x.dtype),
        grid_spec=pltpu.PrefetchScalarGridSpec(
            num_scalar_prefetch=1,
            grid=(n_tiles, k),                         # samples innermost
            in_specs=[
                pl.BlockSpec((tile_rows, _LANES), lambda j, i, seed: (j, 0)),
                pl.BlockSpec((tile_rows, _LANES), lambda j, i, seed: (j, 0)),
            ],
            out_specs=pl.BlockSpec((1, tile_rows, _LANES),
                                   lambda j, i, seed: (i, j, 0)),
        ),
        compiler_params=pltpu.CompilerParams(
            dimension_semantics=("parallel", "parallel"),
        ),
    )(seed_arr, lower2, upper2)

    out = out.reshape(k, n_pad)[:, :n]
    return out.reshape((k,) + batch_shape + (dim,))


if __name__ == "__main__":
    key = jax.random.PRNGKey(0)
    dim = 32
    k = 4
    # x: batch dims (2, 4), feature = 2*dim -> (2, 4, 64)
    x = jax.random.normal(key, (2, 4, 2 * dim), dtype=jnp.float32)

    out = sample_uniform(x, dim=dim, k=k, seed=0)
    out = jax.block_until_ready(out)

    # Sanity: shape, samples lie within [min(lower,upper), max(lower,upper)],
    # and the k samples are not all identical.
    assert out.shape == (k, 2, 4, dim), out.shape
    lower = x[..., :dim]
    upper = x[..., dim:]
    lo = jnp.minimum(lower, upper)[None]
    hi = jnp.maximum(lower, upper)[None]
    assert bool(jnp.all(out >= lo - 1e-6)) and bool(jnp.all(out <= hi + 1e-6))
    assert not bool(jnp.allclose(out[0], out[1]))

    # Different seed -> different draws, same seed -> deterministic.
    out2 = jax.block_until_ready(sample_uniform(x, dim=dim, k=k, seed=1))
    out0 = jax.block_until_ready(sample_uniform(x, dim=dim, k=k, seed=0))
    assert not bool(jnp.allclose(out, out2))
    assert bool(jnp.allclose(out, out0))

    print("KERNEL_OK")
</pallas_src>

<mosaic_0001>
module attributes {stable_mosaic.version = 11 : i64} {
  func.func @_kernel(%arg0: i32, %arg1: i32, %arg2: memref<1xi32, #tpu.memory_space<smem>>, %arg3: memref<8x128xf32, #tpu.memory_space<vmem>>, %arg4: memref<8x128xf32, #tpu.memory_space<vmem>>, %arg5: memref<1x8x128xf32, #tpu.memory_space<vmem>>) attributes {dimension_semantics = [#tpu.dimension_semantics<parallel>, #tpu.dimension_semantics<parallel>], iteration_bounds = array<i64: 1, 4>, scalar_prefetch = 1 : i64, scratch_operands = 0 : i64, tpu.core_type = #tpu.core_type<tc>, window_params = [{transform_indices = @transform_0, window_bounds = array<i64: 8, 128>}, {transform_indices = @transform_1, window_bounds = array<i64: 8, 128>}, {transform_indices = @transform_2, window_bounds = array<i64: 1, 8, 128>}]} {
    %c4_i32 = arith.constant 4 : i32
    %0 = arith.muli %arg0, %c4_i32 : i32
    %1 = arith.addi %0, %arg1 : i32
    %c1024_i32 = arith.constant 1024 : i32
    %2 = arith.muli %1, %c1024_i32 : i32
    %3 = tpu.iota {dimensions = array<i32: 0>} : vector<8x128xi32>
    %4 = tpu.iota {dimensions = array<i32: 1>} : vector<8x128xi32>
    %c128_i32 = arith.constant 128 : i32
    %5 = vector.broadcast %c128_i32 : i32 to vector<8x128xi32>
    %6 = arith.muli %3, %5 : vector<8x128xi32>
    %7 = vector.broadcast %2 : i32 to vector<8x128xi32>
    %8 = arith.addi %7, %6 : vector<8x128xi32>
    %9 = arith.addi %8, %4 : vector<8x128xi32>
    %c0 = arith.constant 0 : index
    %10 = memref.load %arg2[%c0] : memref<1xi32, #tpu.memory_space<smem>>
    %11 = vector.broadcast %10 : i32 to vector<8x128xi32>
    %12 = arith.xori %9, %11 : vector<8x128xi32>
    %c16_i32 = arith.constant 16 : i32
    %13 = vector.broadcast %c16_i32 : i32 to vector<8x128xi32>
    %14 = arith.shrui %12, %13 : vector<8x128xi32>
    %15 = arith.xori %12, %14 : vector<8x128xi32>
    %c-2048144789_i32 = arith.constant -2048144789 : i32
    %16 = vector.broadcast %c-2048144789_i32 : i32 to vector<8x128xi32>
    %17 = arith.muli %15, %16 : vector<8x128xi32>
    %c13_i32 = arith.constant 13 : i32
    %18 = vector.broadcast %c13_i32 : i32 to vector<8x128xi32>
    %19 = arith.shrui %17, %18 : vector<8x128xi32>
    %20 = arith.xori %17, %19 : vector<8x128xi32>
    %c-1028477387_i32 = arith.constant -1028477387 : i32
    %21 = vector.broadcast %c-1028477387_i32 : i32 to vector<8x128xi32>
    %22 = arith.muli %20, %21 : vector<8x128xi32>
    %c16_i32_0 = arith.constant 16 : i32
    %23 = vector.broadcast %c16_i32_0 : i32 to vector<8x128xi32>
    %24 = arith.shrui %22, %23 : vector<8x128xi32>
    %25 = arith.xori %22, %24 : vector<8x128xi32>
    %c8_i32 = arith.constant 8 : i32
    %26 = vector.broadcast %c8_i32 : i32 to vector<8x128xi32>
    %27 = arith.shrui %25, %26 : vector<8x128xi32>
    %28 = arith.sitofp %27 : vector<8x128xi32> to vector<8x128xf32>
    %cst = arith.constant 5.96046448E-8 : f32
    %29 = vector.broadcast %cst : f32 to vector<8x128xf32>
    %30 = arith.mulf %28, %29 : vector<8x128xf32>
    %c0_1 = arith.constant 0 : index
    %c0_2 = arith.constant 0 : index
    %31 = vector.load %arg3[%c0_1, %c0_2] : memref<8x128xf32, #tpu.memory_space<vmem>>, vector<8x128xf32>
    %c0_3 = arith.constant 0 : index
    %c0_4 = arith.constant 0 : index
    %32 = vector.load %arg4[%c0_3, %c0_4] : memref<8x128xf32, #tpu.memory_space<vmem>>, vector<8x128xf32>
    %33 = arith.subf %32, %31 : vector<8x128xf32>
    %34 = arith.mulf %30, %33 : vector<8x128xf32>
    %35 = arith.addf %31, %34 : vector<8x128xf32>
    %c0_5 = arith.constant 0 : index
    %c0_6 = arith.constant 0 : index
    %c0_7 = arith.constant 0 : index
    %36 = vector.load %arg5[%c0_5, %c0_6, %c0_7] : memref<1x8x128xf32, #tpu.memory_space<vmem>>, vector<1x8x128xf32>
    %37 = vector.shape_cast %36 : vector<1x8x128xf32> to vector<8x128xf32>
    %38 = vector.shape_cast %35 : vector<8x128xf32> to vector<1x8x128xf32>
    tpu.vector_store %arg5[%c0_5, %c0_6, %c0_7], %38 {strides = array<i32>} : memref<1x8x128xf32, #tpu.memory_space<vmem>>, vector<1x8x128xf32>,
    return
  }
  func.func @transform_0(%arg0: i32, %arg1: i32, %arg2: memref<1xi32, #tpu.memory_space<smem>>) -> (i32, i32) {
    %c0_i32 = arith.constant 0 : i32
    %c0_i32_0 = arith.constant 0 : i32
    return %arg0, %c0_i32 : i32, i32
  }
  func.func @transform_1(%arg0: i32, %arg1: i32, %arg2: memref<1xi32, #tpu.memory_space<smem>>) -> (i32, i32) {
    %c0_i32 = arith.constant 0 : i32
    %c0_i32_0 = arith.constant 0 : i32
    return %arg0, %c0_i32 : i32, i32
  }
  func.func @transform_2(%arg0: i32, %arg1: i32, %arg2: memref<1xi32, #tpu.memory_space<smem>>) -> (i32, i32, i32) {
    %c0_i32 = arith.constant 0 : i32
    %c0_i32_0 = arith.constant 0 : i32
    return %arg1, %arg0, %c0_i32 : i32, i32, i32
  }
}

</mosaic_0001>

<bundles_post_ra>
// kernel: tpu_custom_call.1
= control target key start
LH: loop header
LB: loop body
LE: loop exit
PB: predicated region body
PF: predicated region fallthrough
CT: control target
= control target key end

     0   :  { %s696_s0 = inlined_call_operand.<no memory space> [shape: s32[1], index: 0, kind: input, shape index: {}]   ;;  %s697_s1 = inlined_call_operand.hbm [shape: f32[8,128], index: 1, kind: input, shape index: {}]   ;;  %s698_s2 = inlined_call_operand.hbm [shape: f32[8,128], index: 2, kind: input, shape index: {}]   ;;  %s699_s3 = inlined_call_operand.hbm [shape: f32[4,8,128], index: 3, kind: output, shape index: {}]  }
   0x1   :  { %8 = sst [smem:[#allocation3]] %s696_s0 }
   0x2   :  { %9 = vsyncpa [#allocation5], 0 }
   0x3   :  { %10 = vsyncpa [#allocation8], 0 }
   0x4   :  { %11 = vsyncpa [#allocation6], 0 }
   0x5   :  { %13 = vsyncpa [#allocation6 + $0x1], 0  ;;  %s575_s14 = smov 0   ;;  %s577_s15 = smov 0  }
   0x6   :  { %s579_s16 = smov 0   ;;  %s581_s17 = smov 0  }
   0x7   :  { %s583_s18 = smov 0   ;;  %s585_s19 = smov 0  }
   0x8 LB: > { %s312_s0 = sadd.s32 4294967295, %s548_s19   ;;  %s313_s20 = sadd.s32 4294967294, %s548_s19   ;;  %s548_s19 = sphi %s585_s19, %s19_s19   ;;  %s544_s18 = sphi %s583_s18, %s708_s18   ;;  %s540_s17 = sphi %s581_s17, %s707_s17   ;;  %s536_s16 = sphi %s579_s16, %s706_s16   ;;  %s532_s15 = sphi %s577_s15, %s705_s15   ;;  %s528_s14 = sphi %s575_s14, %s704_s14  }
   0x9   : > { %s28_s21 = sadd.s32 1, %s544_s18  ;;  %s92_s22 = sadd.s32 1, %s536_s16 }
   0xa   : > { %p29_p0 = scmp.ge.s32.totalorder %s28_s21, 4  ;;  %p102_p1 = scmp.ne.s32.totalorder %s536_s16, %s532_s15 }
   0xb   : > { %p103_p2 = scmp.eq.s32.totalorder %s312_s0, 3  ;;  %p108_p3 = scmp.ne.s32.totalorder %s532_s15, %s528_s14 }
   0xc   : > { %s710_s21 = smov (%p29_p0, %s28_s21), 0  ;;  %p109_p5 = scmp.eq.s32.totalorder %s313_s20, 3 }
   0xd   : > { %p615_p4 = por %p103_p2, %p102_p1  ;;  %s87_s24 = ssub.s32 %s544_s18, %s710_s21 }
   0xe   : > { %p314_p6 = scmp.ge.s32.totalorder %s548_s19, 1  ;;  %p90_p7 = scmp.eq.s32.totalorder %s87_s24, 0 }
   0xf   : > { %p622_p8 = por %p109_p5, %p108_p3  ;;  %p116_p9 = scmp.lt.s32.totalorder %s548_s19, 5 }
  0x10   : > { %s628_s26 = scalar_select %p90_p7, %s536_s16, %s92_s22  }
  0x11   : > { %p630_p10 = pnand %p314_p6, %p116_p9  ;;  %p634_p11 = scmp.eq.s32.totalorder %s312_s0, 0 }
  0x12   : > { %s130_s4 = sshll.u32 %s697_s1, 4  ;;  %s550_s5 = smov [#allocation4]   ;;  %s131_s4 = int_to_ptr.hbm [resolvable:$true] %s130_s4 }
  0x13   : > { %p336_p12 = pneg %p630_p10  ;;  %s132_s6 = sshll.u32 %s550_s5, 4  ;;  %s133_s6 = int_to_ptr.vmem [resolvable:$true] %s132_s6 }
  0x14   : > { %s144_s9 = sshll.u32 %s698_s2, 4  ;;  %s551_s10 = smov [#allocation7]   ;;  %s145_s9 = int_to_ptr.hbm [resolvable:$true] %s144_s9 }
  0x15   : > { %p337_p13 = pnand %p634_p11, %p336_p12  ;;  %s146_s11 = sshll.u32 %s551_s10, 4  ;;  %s147_s11 = int_to_ptr.vmem [resolvable:$true] %s146_s11 }
  0x16   : > { %159 = sbr.rel (%p630_p10) target bundleno = 71 (0x47), region = 28 }
  0x17   : > { %339 = dma.hbm_to_vmem [thread:$0]  (!%p337_p13), %s131_s4, 128, %s133_s6, [#allocation5]  }
  0x18   : > { %342 = dma.hbm_to_vmem [thread:$0]  (!%p337_p13), %s145_s9, 128, %s147_s11, [#allocation8]  }
  0x1b   : > { %515 = dma.done.wait (%p634_p11), [#allocation5], 128  }
  0x1c   : > { %517 = vsyncadd (%p634_p11), [#allocation5], 4294967168 }
  0x1d   : > { %519 = dma.done.wait (%p634_p11), [#allocation8], 128  }
  0x1e   : > { %521 = vsyncadd (%p634_p11), [#allocation8], 4294967168  ;;  %s321_s12 = sshll.u32 %s540_s17, 10  ;;  %v185_v0 = vlaneseq  ;;  %s193_s13 = sld [smem:[#allocation3]]  ;;  %v207_v17 = vld [vmem:[#allocation4] sm:$0xff]  ;;  %v208_v18 = vld [vmem:[#allocation7] sm:$0xff] }
  0x1f   : > { %v190_v2 = vstv %s321_s12  ;;  %s179_s0 = sand.u32 1, %s532_s15   ;;  %s323_s22 = sshll.u32 %s540_s17, 3  ;;  %v209_v21 = vsub.f32 %v208_v18, %v207_v17 }
  0x20   : > { %v186_v1 = vshrl.u32 %v185_v0, 7  ;;  %v188_v3 = vand.u32 127, %v185_v0  ;;  %s320_s20 = sshll.u32 %s179_s0, 3  ;;  %s225_s28 = scalar_lea.hbm %s699_s3, %s323_s22 }
  0x21   : > { %s181_s29 = scalar_lea.vmem [#allocation9], %s320_s20  ;;  %s229_s4 = sshll.u32 %s225_s28, 4  ;;  %s230_s4 = int_to_ptr.hbm [resolvable:$true] %s229_s4 }
  0x22   : > { %v189_v4 = vmul.u32 128, %v186_v1  ;;  %s227_s30 = sshll.u32 %s181_s29, 4  ;;  %s214_s5 = scalar_lea.sflag [#allocation6], %s179_s0  ;;  %s228_s30 = int_to_ptr.vmem [resolvable:$true] %s227_s30 }
  0x23   : > { %s476_s6 = sshra.s32 %s230_s4, 4  ;;  %s482_s9 = scalar_lea.hbm %s699_s3, 32  ;;  %s477_s6 = int_to_ptr.hbm [resolvable:$true] %s476_s6 }
  0x24   : > { %v191_v5 = vadd.s32 %v190_v2, %v189_v4  ;;  %v194_v6 = vstv %s193_s13  ;;  %s478_s17 = scalar_lea.hbm %s477_s6, 8  ;;  %p483_p3 = scmp.lt.s32.totalorder %s477_s6, %s699_s3 }
  0x25   : > { %p479_p0 = scmp.ne.s32.totalorder %s477_s6, %s478_s17  ;;  %p484_p5 = scmp.lt.s32.totalorder %s482_s9, %s478_s17 }
  0x26   : > { %v192_v7 = vadd.s32 %v191_v5, %v188_v3 }
  0x27   : > { %p480_p1 = pnand %p479_p0, %p615_p4  ;;  %p485_p6 = por %p484_p5, %p483_p3 }
  0x28   : > { %v195_v8 = vxor.u32 %v194_v6, %v192_v7 }
  0x29   : > { %p481_p2 = pneg %p480_p1 }
  0x2a   : > { %v196_v9 = vshrl.u32 %v195_v8, 16 }
  0x2b   : > { %p486_p7 = pnand %p485_p6, %p481_p2 }
  0x2c   : > { %v197_v10 = vxor.u32 %v196_v9, %v195_v8 }
  0x2e   : > { %v198_v11 = vmul.u32 2246822507, %v197_v10 }
  0x30   : > { %v199_v12 = vshrl.u32 %v198_v11, 13 }
  0x32   : > { %v200_v13 = vxor.u32 %v199_v12, %v198_v11 }
  0x34   : > { %v201_v14 = vmul.u32 3266489909, %v200_v13 }
  0x36   : > { %v202_v15 = vshrl.u32 %v201_v14, 16 }
  0x38   : > { %v203_v16 = vxor.u32 %v202_v15, %v201_v14 }
  0x3a   : > { %v204_v19 = vshrl.u32 %v203_v16, 8 }
  0x3c   : > { %v205_v20 = vcvt.s32.f32 %v204_v19 }
  0x3e   : > { %v206_v22 = vmul.f32 5.9604645e-08, %v205_v20 }
  0x40   : > { %v210_v23 = vmul.f32 %v209_v21, %v206_v22 }
  0x42   : > { %v211_v24 = vadd.f32 %v210_v23, %v207_v17 }
  0x44   : > { %212 = vst [vmem:[%s181_s29] sm:$0xff] %v211_v24 }
  0x45   : > { %489 = shalt.err (!%p486_p7)
}
  0x46   : > { %334 = dma.vmem_to_hbm [thread:$0]  (%p615_p4), %s228_s30, 128, %s230_s4, %s214_s5  }
  0x47 PF: > { %p351_p9 = scmp.ge.s32.totalorder %s548_s19, 2  ;;  %s241_s12 = sand.u32 1, %s528_s14  }
  0x48   : > { %s242_s13 = scalar_lea.sflag [#allocation6], %s241_s12 }
  0x49   : > { %p344_p10 = pnand %p351_p9, %p622_p8 }
  0x4b   : > { %p345_p11 = pneg %p344_p10 }
  0x4d   : > { %523 = dma.done.wait (%p345_p11), %s242_s13, 128  }
  0x4e   : > { %525 = vsyncadd (%p345_p11), %s242_s13, 4294967168  ;;  %s19_s19 = sadd.s32 1, %s548_s19   ;;  %s704_s14 = smov %s532_s15 }
  0x4f   : > { %p16_p12 = scmp.ge.s32.totalorder %s19_s19, 6   ;;  %s705_s15 = smov %s536_s16 }
  0x50   : > { %s706_s16 = smov %s628_s26  ;;  %s707_s17 = smov %s544_s18 }
  0x51   : > { %s708_s18 = smov %s710_s21  ;;  %18 = sbr.rel (!%p16_p12) target bundleno = 8 (0x8), region = 71 }
  0x56   :  { %248 = vsyncpa [#allocation5], 1 }
  0x57   :  { %250 = vsyncpa [#allocation5 + $0x1], 1 }
  0x58   :  { %251 = vsyncpa [#allocation8], 1 }
  0x59   :  { %252 = vsyncpa [#allocation6], 1 }
  0x5a   :  { %254 = vsyncpa [#allocation6 + $0x1], 1 }

</bundles_post_ra>
